<compile_context>
chip_gen: v7x
topology: tpu7x:2x2x1
jax: 0.10.0
libtpu: 0.0.40
codegen_flags: <defaults>
</compile_context>

<pallas_src>
import jax
import jax.numpy as jnp
from jax.experimental import pallas as pl
from jax.experimental.pallas import tpu as pltpu

HIDDEN = 256


def actor_kernel(obs_ref, w1_ref, b1_ref, w2_ref, b2_ref, wh_ref, bh_ref,
                 scale_ref, offset_ref, out_ref):
    # In-kernel cast to bf16 (saves a wrapper-side XLA pass over obs).
    x = obs_ref[...].astype(jnp.bfloat16)

    # Layer 1: Linear(obs_dim, 256) + ReLU.  bf16 operands, f32 MXU accumulate.
    h1 = jnp.dot(x, w1_ref[...], preferred_element_type=jnp.float32)
    h1 = jnp.maximum(h1 + b1_ref[...], 0.0).astype(jnp.bfloat16)

    # Layer 2: Linear(256, 256) + ReLU.
    h2 = jnp.dot(h1, w2_ref[...], preferred_element_type=jnp.float32)
    h2 = jnp.maximum(h2 + b2_ref[...], 0.0).astype(jnp.bfloat16)

    # Fused heads: Linear(256, 2).  Column 0 has 0.5 pre-folded into (wh, bh),
    # so sigmoid(x) = 0.5*tanh(x/2) + 0.5 costs a single tanh (one EUP pass).
    z = jnp.dot(h2, wh_ref[...], preferred_element_type=jnp.float32) + bh_ref[...]
    t = jnp.tanh(z)

    # Per-column FMA epilogue: scale=[0.5,1.0], offset=[0.5,0.0]
    #   col 0 -> 0.5*tanh(x/2)+0.5 == sigmoid(x),  col 1 -> tanh(x).
    out_ref[...] = (t * scale_ref[...] + offset_ref[...]).astype(out_ref.dtype)


def _round_up(x, m):
    return (x + m - 1) // m * m


def _choose_tile(B, cap=1024):
    """Pick (TM, B_pad).

    * B (padded to 16) <= cap: one grid step covering the whole batch
      (minimal padding, minimal per-step overhead).
    * larger B: >=2 near-equal tiles (multiple of 16 rows, <= cap) so the
      "parallel" batch axis actually spreads over both v7x TensorCores and
      padding waste stays < 16 + tile-remainder rows (no round-up-to-cap
      pathology).
    """
    b16 = _round_up(B, 16)
    if b16 <= cap:
        return b16, b16
    n_steps = max(2, pl.cdiv(b16, cap))
    tm = min(cap, _round_up(pl.cdiv(b16, n_steps), 16))
    b_pad = _round_up(B, tm)
    return tm, b_pad


def actor_forward(obs, kparams, *, tile_cap=1024):
    """obs: (B, obs_dim) float32. kparams from prepare_params(). Returns (B, 2) f32."""
    w1, b1, w2, b2, wh, bh, scale, offset = kparams
    B, obs_dim = obs.shape

    TM, B_pad = _choose_tile(B, tile_cap)
    if B_pad != B:
        obs = jnp.pad(obs, ((0, B_pad - B), (0, 0)))

    def resident(shape):
        # Constant block index -> DMA'd once, stays resident in VMEM across the grid.
        return pl.BlockSpec(shape, lambda i: (0, 0))

    out = pl.pallas_call(
        actor_kernel,
        out_shape=jax.ShapeDtypeStruct((B_pad, 2), jnp.float32),
        grid=(B_pad // TM,),
        in_specs=[
            pl.BlockSpec((TM, obs_dim), lambda i: (i, 0)),   # obs (f32): tiled over batch
            resident((obs_dim, HIDDEN)),                     # w1 (bf16)
            resident((1, HIDDEN)),                           # b1 (f32)
            resident((HIDDEN, HIDDEN)),                      # w2 (bf16)
            resident((1, HIDDEN)),                           # b2 (f32)
            resident((HIDDEN, 2)),                           # fused head weights (bf16)
            resident((1, 2)),                                # fused head bias (f32)
            resident((1, 2)),                                # post-tanh scale (f32)
            resident((1, 2)),                                # post-tanh offset (f32)
        ],
        out_specs=pl.BlockSpec((TM, 2), lambda i: (i, 0)),
        compiler_params=pltpu.CompilerParams(
            dimension_semantics=("parallel",),               # v7x: shard batch over 2 TCs
        ),
    )(obs, w1, b1, w2, b2, wh, bh, scale, offset)

    return out[:B]


def init_params(key, obs_dim, hidden=HIDDEN):
    """PyTorch-style uniform(+-1/sqrt(fan_in)) init; weights as (in, out), f32.

    Biases are kept 2-D (1, out_features) for clean TPU broadcasting.
    """
    ks = jax.random.split(key, 8)

    def lin(kw, kb, fan_in, fan_out):
        bound = 1.0 / jnp.sqrt(fan_in)
        w = jax.random.uniform(kw, (fan_in, fan_out), jnp.float32, -bound, bound)
        b = jax.random.uniform(kb, (1, fan_out), jnp.float32, -bound, bound)
        return w, b

    w1, b1 = lin(ks[0], ks[1], obs_dim, hidden)       # Linear(obs_dim, 256)
    w2, b2 = lin(ks[2], ks[3], hidden, hidden)        # Linear(256, 256)
    wl, bl = lin(ks[4], ks[5], hidden, 1)             # pi_lin head
    wa, ba = lin(ks[6], ks[7], hidden, 1)             # pi_ang head
    wh = jnp.concatenate([wl, wa], axis=1)            # (256, 2) fused heads
    bh = jnp.concatenate([bl, ba], axis=1)            # (1, 2)
    return w1, b1, w2, b2, wh, bh


def prepare_params(params):
    """Kernel-ready params: bf16 weights, f32 biases, 0.5 folded into sigmoid head.

    Column 0 of (wh, bh) is scaled by 0.5 so the kernel can compute
    sigmoid(x) = 0.5*tanh(x/2) + 0.5 with a single tanh.  Scaling by a power of
    two is exact and commutes with the bf16 cast.  The post-tanh per-column
    affine (scale, offset) is passed as tiny resident arrays so the kernel's
    epilogue is a single FMA (no iota / compare / select per grid step).
    """
    w1, b1, w2, b2, wh, bh = params
    head_scale = jnp.array([[0.5, 1.0]], jnp.float32)
    post_scale = jnp.array([[0.5, 1.0]], jnp.float32)   # col0: 0.5*t, col1: t
    post_offset = jnp.array([[0.5, 0.0]], jnp.float32)  # col0: +0.5, col1: +0
    return (
        w1.astype(jnp.bfloat16), b1,
        w2.astype(jnp.bfloat16), b2,
        (wh * head_scale).astype(jnp.bfloat16), bh * head_scale,
        post_scale, post_offset,
    )


def actor_reference(obs, params):
    """Plain-JAX f32 reference (exact module semantics)."""
    w1, b1, w2, b2, wh, bh = params
    h1 = jnp.maximum(obs @ w1 + b1, 0.0)
    h2 = jnp.maximum(h1 @ w2 + b2, 0.0)
    z = h2 @ wh + bh
    return jnp.concatenate([jax.nn.sigmoid(z[:, :1]), jnp.tanh(z[:, 1:])], axis=-1)


def actor_reference_bf16(obs, params):
    """Plain-JAX reference matching the kernel's bf16-input / f32-accumulate math."""
    w1, b1, w2, b2, wh, bh = params
    x = obs.astype(jnp.bfloat16)
    h1 = jnp.dot(x, w1.astype(jnp.bfloat16), preferred_element_type=jnp.float32) + b1
    h1 = jnp.maximum(h1, 0.0).astype(jnp.bfloat16)
    h2 = jnp.dot(h1, w2.astype(jnp.bfloat16), preferred_element_type=jnp.float32) + b2
    h2 = jnp.maximum(h2, 0.0).astype(jnp.bfloat16)
    z = jnp.dot(h2, wh.astype(jnp.bfloat16), preferred_element_type=jnp.float32) + bh
    return jnp.concatenate([jax.nn.sigmoid(z[:, :1]), jnp.tanh(z[:, 1:])], axis=-1)


if __name__ == "__main__":
    key = jax.random.PRNGKey(0)
    k_obs, k_par, k_obs2 = jax.random.split(key, 3)

    batch, obs_dim = 8, 24           # small, consistent with (B, obs_dim) input
    obs = jax.random.normal(k_obs, (batch, obs_dim), jnp.float32)

    params = init_params(k_par, obs_dim)      # module-semantics f32 params
    kparams = prepare_params(params)          # bf16 / folded-head kernel params

    # --- small batch (single grid step, padded 8 -> 16 rows) ---
    out = actor_forward(obs, kparams)
    out = jax.block_until_ready(out)
    assert out.shape == (batch, 2)

    # Check vs a reference using the same bf16-input / f32-accumulate math.
    ref_bf16 = actor_reference_bf16(obs, params)
    assert jnp.allclose(out, ref_bf16, atol=2e-3, rtol=2e-3), "mismatch vs bf16 reference"

    # Loose sanity check vs full-f32 module semantics (bf16 quantization only).
    ref_f32 = actor_reference(obs, params)
    assert jnp.max(jnp.abs(out - ref_f32)) < 1e-1, "mismatch vs f32 reference"

    # --- modest batch exercising the multi-step (>=2 tiles, v7x-parallel) path ---
    batch2 = 1100
    obs2 = jax.random.normal(k_obs2, (batch2, obs_dim), jnp.float32)
    out2 = jax.block_until_ready(actor_forward(obs2, kparams))
    assert out2.shape == (batch2, 2)
    ref2 = actor_reference_bf16(obs2, params)
    assert jnp.allclose(out2, ref2, atol=2e-3, rtol=2e-3), "mismatch on multi-tile path"

    print("KERNEL_OK")
</pallas_src>

<mosaic_0001>
module attributes {stable_mosaic.version = 11 : i64} {
  func.func @actor_kernel(%arg0: i32, %arg1: memref<16x24xf32, #tpu.memory_space<vmem>>, %arg2: memref<24x256xbf16, #tpu.memory_space<vmem>>, %arg3: memref<1x256xf32, #tpu.memory_space<vmem>>, %arg4: memref<256x256xbf16, #tpu.memory_space<vmem>>, %arg5: memref<1x256xf32, #tpu.memory_space<vmem>>, %arg6: memref<256x2xbf16, #tpu.memory_space<vmem>>, %arg7: memref<1x2xf32, #tpu.memory_space<vmem>>, %arg8: memref<1x2xf32, #tpu.memory_space<vmem>>, %arg9: memref<1x2xf32, #tpu.memory_space<vmem>>, %arg10: memref<16x2xf32, #tpu.memory_space<vmem>>) attributes {dimension_semantics = [#tpu.dimension_semantics<parallel>], iteration_bounds = array<i64: 1>, scalar_prefetch = 0 : i64, scratch_operands = 0 : i64, tpu.core_type = #tpu.core_type<tc>, window_params = [{transform_indices = @transform_0, window_bounds = array<i64: 16, 24>}, {pipeline_mode = #tpu.pipeline_mode<synchronous>, transform_indices = @transform_1, window_bounds = array<i64: 24, 256>}, {pipeline_mode = #tpu.pipeline_mode<synchronous>, transform_indices = @transform_2, window_bounds = array<i64: 1, 256>}, {pipeline_mode = #tpu.pipeline_mode<synchronous>, transform_indices = @transform_3, window_bounds = array<i64: 256, 256>}, {pipeline_mode = #tpu.pipeline_mode<synchronous>, transform_indices = @transform_4, window_bounds = array<i64: 1, 256>}, {pipeline_mode = #tpu.pipeline_mode<synchronous>, transform_indices = @transform_5, window_bounds = array<i64: 256, 2>}, {pipeline_mode = #tpu.pipeline_mode<synchronous>, transform_indices = @transform_6, window_bounds = array<i64: 1, 2>}, {pipeline_mode = #tpu.pipeline_mode<synchronous>, transform_indices = @transform_7, window_bounds = array<i64: 1, 2>}, {pipeline_mode = #tpu.pipeline_mode<synchronous>, transform_indices = @transform_8, window_bounds = array<i64: 1, 2>}, {transform_indices = @transform_9, window_bounds = array<i64: 16, 2>}]} {
    %c0 = arith.constant 0 : index
    %c0_0 = arith.constant 0 : index
    %0 = vector.load %arg1[%c0, %c0_0] : memref<16x24xf32, #tpu.memory_space<vmem>>, vector<16x24xf32>
    %1 = arith.truncf %0 : vector<16x24xf32> to vector<16x24xbf16>
    %c0_1 = arith.constant 0 : index
    %c0_2 = arith.constant 0 : index
    %2 = vector.load %arg2[%c0_1, %c0_2] : memref<24x256xbf16, #tpu.memory_space<vmem>>, vector<24x256xbf16>
    %cst = arith.constant dense<0.000000e+00> : vector<16x256xf32>
    %3 = tpu.matmul %1, %2, %cst {dimension_numbers = #tpu.dot_dimension_numbers<[1], [0], [0], [1], [0, 0, 1, 1], [], []>} : vector<16x24xbf16>, vector<24x256xbf16>, vector<16x256xf32> -> vector<16x256xf32>
    %c0_3 = arith.constant 0 : index
    %c0_4 = arith.constant 0 : index
    %4 = vector.load %arg3[%c0_3, %c0_4] : memref<1x256xf32, #tpu.memory_space<vmem>>, vector<1x256xf32>
    %5 = vector.broadcast %4 : vector<1x256xf32> to vector<16x256xf32>
    %6 = arith.addf %3, %5 : vector<16x256xf32>
    %cst_5 = arith.constant 0.000000e+00 : f32
    %7 = vector.broadcast %cst_5 : f32 to vector<16x256xf32>
    %8 = arith.maximumf %6, %7 : vector<16x256xf32>
    %9 = arith.truncf %8 : vector<16x256xf32> to vector<16x256xbf16>
    %c0_6 = arith.constant 0 : index
    %c0_7 = arith.constant 0 : index
    %10 = vector.load %arg4[%c0_6, %c0_7] : memref<256x256xbf16, #tpu.memory_space<vmem>>, vector<256x256xbf16>
    %cst_8 = arith.constant dense<0.000000e+00> : vector<16x256xf32>
    %11 = tpu.matmul %9, %10, %cst_8 {dimension_numbers = #tpu.dot_dimension_numbers<[1], [0], [0], [1], [0, 0, 1, 1], [], []>} : vector<16x256xbf16>, vector<256x256xbf16>, vector<16x256xf32> -> vector<16x256xf32>
    %c0_9 = arith.constant 0 : index
    %c0_10 = arith.constant 0 : index
    %12 = vector.load %arg5[%c0_9, %c0_10] : memref<1x256xf32, #tpu.memory_space<vmem>>, vector<1x256xf32>
    %13 = vector.broadcast %12 : vector<1x256xf32> to vector<16x256xf32>
    %14 = arith.addf %11, %13 : vector<16x256xf32>
    %cst_11 = arith.constant 0.000000e+00 : f32
    %15 = vector.broadcast %cst_11 : f32 to vector<16x256xf32>
    %16 = arith.maximumf %14, %15 : vector<16x256xf32>
    %17 = arith.truncf %16 : vector<16x256xf32> to vector<16x256xbf16>
    %c0_12 = arith.constant 0 : index
    %c0_13 = arith.constant 0 : index
    %18 = vector.load %arg6[%c0_12, %c0_13] : memref<256x2xbf16, #tpu.memory_space<vmem>>, vector<256x2xbf16>
    %cst_14 = arith.constant dense<0.000000e+00> : vector<16x2xf32>
    %19 = tpu.matmul %17, %18, %cst_14 {dimension_numbers = #tpu.dot_dimension_numbers<[1], [0], [0], [1], [0, 0, 1, 1], [], []>} : vector<16x256xbf16>, vector<256x2xbf16>, vector<16x2xf32> -> vector<16x2xf32>
    %c0_15 = arith.constant 0 : index
    %c0_16 = arith.constant 0 : index
    %20 = vector.load %arg7[%c0_15, %c0_16] : memref<1x2xf32, #tpu.memory_space<vmem>>, vector<1x2xf32>
    %21 = vector.broadcast %20 : vector<1x2xf32> to vector<16x2xf32>
    %22 = arith.addf %19, %21 : vector<16x2xf32>
    %23 = math.tanh %22 : vector<16x2xf32>
    %c0_17 = arith.constant 0 : index
    %c0_18 = arith.constant 0 : index
    %24 = vector.load %arg8[%c0_17, %c0_18] : memref<1x2xf32, #tpu.memory_space<vmem>>, vector<1x2xf32>
    %25 = vector.broadcast %24 : vector<1x2xf32> to vector<16x2xf32>
    %26 = arith.mulf %23, %25 : vector<16x2xf32>
    %c0_19 = arith.constant 0 : index
    %c0_20 = arith.constant 0 : index
    %27 = vector.load %arg9[%c0_19, %c0_20] : memref<1x2xf32, #tpu.memory_space<vmem>>, vector<1x2xf32>
    %28 = vector.broadcast %27 : vector<1x2xf32> to vector<16x2xf32>
    %29 = arith.addf %26, %28 : vector<16x2xf32>
    %c0_21 = arith.constant 0 : index
    %c0_22 = arith.constant 0 : index
    %30 = vector.load %arg10[%c0_21, %c0_22] : memref<16x2xf32, #tpu.memory_space<vmem>>, vector<16x2xf32>
    tpu.vector_store %arg10[%c0_21, %c0_22], %29 {strides = array<i32>} : memref<16x2xf32, #tpu.memory_space<vmem>>, vector<16x2xf32>,
    return
  }
  func.func @transform_0(%arg0: i32) -> (i32, i32) {
    %c0_i32 = arith.constant 0 : i32
    %c0_i32_0 = arith.constant 0 : i32
    return %arg0, %c0_i32 : i32, i32
  }
  func.func @transform_1(%arg0: i32) -> (i32, i32) {
    %c0_i32 = arith.constant 0 : i32
    %c0_i32_0 = arith.constant 0 : i32
    %c0_i32_1 = arith.constant 0 : i32
    return %c0_i32, %c0_i32_0 : i32, i32
  }
  func.func @transform_2(%arg0: i32) -> (i32, i32) {
    %c0_i32 = arith.constant 0 : i32
    %c0_i32_0 = arith.constant 0 : i32
    %c0_i32_1 = arith.constant 0 : i32
    return %c0_i32, %c0_i32_0 : i32, i32
  }
  func.func @transform_3(%arg0: i32) -> (i32, i32) {
    %c0_i32 = arith.constant 0 : i32
    %c0_i32_0 = arith.constant 0 : i32
    %c0_i32_1 = arith.constant 0 : i32
    return %c0_i32, %c0_i32_0 : i32, i32
  }
  func.func @transform_4(%arg0: i32) -> (i32, i32) {
    %c0_i32 = arith.constant 0 : i32
    %c0_i32_0 = arith.constant 0 : i32
    %c0_i32_1 = arith.constant 0 : i32
    return %c0_i32, %c0_i32_0 : i32, i32
  }
  func.func @transform_5(%arg0: i32) -> (i32, i32) {
    %c0_i32 = arith.constant 0 : i32
    %c0_i32_0 = arith.constant 0 : i32
    %c0_i32_1 = arith.constant 0 : i32
    return %c0_i32, %c0_i32_0 : i32, i32
  }
  func.func @transform_6(%arg0: i32) -> (i32, i32) {
    %c0_i32 = arith.constant 0 : i32
    %c0_i32_0 = arith.constant 0 : i32
    %c0_i32_1 = arith.constant 0 : i32
    return %c0_i32, %c0_i32_0 : i32, i32
  }
  func.func @transform_7(%arg0: i32) -> (i32, i32) {
    %c0_i32 = arith.constant 0 : i32
    %c0_i32_0 = arith.constant 0 : i32
    %c0_i32_1 = arith.constant 0 : i32
    return %c0_i32, %c0_i32_0 : i32, i32
  }
  func.func @transform_8(%arg0: i32) -> (i32, i32) {
    %c0_i32 = arith.constant 0 : i32
    %c0_i32_0 = arith.constant 0 : i32
    %c0_i32_1 = arith.constant 0 : i32
    return %c0_i32, %c0_i32_0 : i32, i32
  }
  func.func @transform_9(%arg0: i32) -> (i32, i32) {
    %c0_i32 = arith.constant 0 : i32
    %c0_i32_0 = arith.constant 0 : i32
    return %arg0, %c0_i32 : i32, i32
  }
}

</mosaic_0001>

<bundles_post_ra>
// kernel: tpu_custom_call.1
= control target key start
LH: loop header
LB: loop body
LE: loop exit
PB: predicated region body
PF: predicated region fallthrough
CT: control target
= control target key end

     0   :  { %14 = vsyncpa [#allocation3], 0  ;;  %s777_s30 = smov [#allocation2]   ;;  %s927_s0 = inlined_call_operand.vmem [shape: f32[16,24], index: 0, kind: input, shape index: {}]   ;;  %s928_s1 = inlined_call_operand.vmem [shape: bf16[24,256], index: 1, kind: input, shape index: {}]   ;;  %s929_s2 = inlined_call_operand.vmem [shape: f32[1,256], index: 2, kind: input, shape index: {}]   ;;  %s930_s3 = inlined_call_operand.hbm [shape: bf16[256,256], index: 3, kind: input, shape index: {}]   ;;  %s931_s4 = inlined_call_operand.vmem [shape: f32[1,256], index: 4, kind: input, shape index: {}]   ;;  %s932_s5 = inlined_call_operand.vmem [shape: bf16[256,2], index: 5, kind: input, shape index: {}]   ;;  %s933_s6 = inlined_call_operand.vmem [shape: f32[1,2], index: 6, kind: input, shape index: {}]   ;;  %s934_s7 = inlined_call_operand.vmem [shape: f32[1,2], index: 7, kind: input, shape index: {}]   ;;  %s935_s8 = inlined_call_operand.vmem [shape: f32[1,2], index: 8, kind: input, shape index: {}]   ;;  %s936_s9 = inlined_call_operand.vmem [shape: f32[16,2], index: 9, kind: output, shape index: {}]  }
   0x1   :  { %s26_s10 = sshll.u32 %s777_s30, 4  ;;  %s753_s13 = scalar_lea.hbm %s930_s3, 4096  ;;  %s27_s10 = int_to_ptr.vmem [resolvable:$true] %s26_s10 }
   0x2   :  { %p754_p0 = scmp.ne.s32.totalorder %s930_s3, %s753_s13  ;;  %p757_p1 = scmp.lt.u32.totalorder %s753_s13, %s930_s3 }
   0x4   :  { %p759_p2 = pnand %p757_p1, %p754_p0 }
   0x6   :  { %762 = shalt.err (!%p759_p2)
}
   0x7   :  { %s763_s18 = scalar_lea.vmem %s27_s10, 4096  ;;  %p768_p4 = scmp.lt.s32.totalorder %s27_s10, %s27_s10 }
   0x8   :  { %p764_p3 = scmp.ne.s32.totalorder %s27_s10, %s763_s18  ;;  %p769_p5 = scmp.lt.s32.totalorder %s763_s18, %s763_s18 }
   0xa   :  { %p770_p6 = por %p769_p5, %p768_p4 }
   0xc   :  { %p771_p7 = pnand %p770_p6, %p764_p3 }
   0xe   :  { %774 = shalt.err (!%p771_p7)
}
   0xf   :  { %s778_s19 = smov 128   ;;  %s779_s20 = smov 8  }
  0x10   :  { %32 = dma.hbm_to_vmem [thread:$0]  %s930_s3, 4096, %s27_s10, [#allocation3], %s778_s19, %s778_s19, %s779_s20  }
  0x11   :  { %775 = dma.done.wait [#allocation3], 4096  }
  0x12   :  { %776 = vsyncadd [#allocation3], 4294963200  ;;  %v780_v0 = vmov 0   ;;  %v680_v1 = vld [vmem:[%s928_s1 + $0x4] ss:$8 sps:$4 sm:$0xff]   ;;  %v52_v3 = vld [vmem:[%s928_s1 + $0x10] sm:$0xff]  ;;  %v55_v53 = vlaneseq }
  0x13   :  { %123 = vmatprep.mubr.bf16.mxu0 %v780_v0  ;;  %v682_v2 = vld [vmem:[%s928_s1] ss:$8 sps:$4 sm:$0xff]   ;;  %vm84_vm0 = vcmask 1043456   ;;  %91 = vmatprep.subr.bf16.mxu0 %v680_v1  ;;  %v600_v5 = vcombine.high %v52_v3, %v52_v3  ;;  %v599_v6 = vcombine.low %v52_v3, %v52_v3  ;;  %v685_v8 = vld [vmem:[#allocation2 + $0x4] ss:$8 sps:$4 sm:$0xff]   ;;  %vm80_vm1 = vcmask 195584  }
  0x14   :  { %v47_v4 = vld [vmem:[%s927_s0] sm:$0xff]  ;;  %v48_v7 = vld [vmem:[%s927_s0 + $0x8] sm:$0xff]  ;;  %92 = vmatpush1.bf16.msra.mxu0 %v682_v2  ;;  %v688_v11 = vld [vmem:[#allocation2 + $0x14] ss:$8 sps:$4 sm:$0xff]   ;;  %344 = vmatprep.subr.bf16.mxu1 %v685_v8  ;;  %v56_v54 = vshrl.u32 %v55_v53, 7  ;;  %vm589_vm2 = vcmask 15360  }
  0x15   :  { %v687_v9 = vld [vmem:[#allocation2] ss:$8 sps:$4 sm:$0xff]   ;;  %601 = vmatprep.subr.msk.bf16.mxu0 %vm84_vm0, %v600_v5  ;;  %v86_v10 = vsel %vm84_vm0, %v599_v6, 0  ;;  %v49_v12 = vpack.c.bf16 %v48_v7, %v47_v4  ;;  %v690_v13 = vld [vmem:[#allocation2 + $0x10] ss:$8 sps:$4 sm:$0xff]  }
  0x16   :  { %345 = vmatpush1.bf16.msra.mxu1 %v687_v9  ;;  %v691_v14 = vld [vmem:[#allocation2 + $0x24] ss:$8 sps:$4 sm:$0xff]   ;;  %v693_v15 = vld [vmem:[#allocation2 + $0x20] ss:$8 sps:$4 sm:$0xff]   ;;  %v694_v16 = vld [vmem:[#allocation2 + $0x34] ss:$8 sps:$4 sm:$0xff]  }
  0x17   :  { %346 = vmatprep.subr.bf16.mxu1 %v688_v11  ;;  %v696_v17 = vld [vmem:[#allocation2 + $0x30] ss:$8 sps:$4 sm:$0xff]   ;;  %v697_v18 = vld [vmem:[#allocation2 + $0x44] ss:$8 sps:$4 sm:$0xff]   ;;  %v699_v19 = vld [vmem:[#allocation2 + $0x40] ss:$8 sps:$4 sm:$0xff]  }
  0x18   :  { %94 = vmatpush1.bf16.msra.mxu0 %v86_v10  ;;  %v700_v20 = vld [vmem:[#allocation2 + $0x54] ss:$8 sps:$4 sm:$0xff]   ;;  %v702_v21 = vld [vmem:[#allocation2 + $0x50] ss:$8 sps:$4 sm:$0xff]   ;;  %v703_v22 = vld [vmem:[#allocation2 + $0x64] ss:$8 sps:$4 sm:$0xff]  }
  0x19   :  { %v705_v23 = vld [vmem:[#allocation2 + $0x60] ss:$8 sps:$4 sm:$0xff]   ;;  %v706_v24 = vld [vmem:[#allocation2 + $0x74] ss:$8 sps:$4 sm:$0xff]   ;;  %v708_v25 = vld [vmem:[#allocation2 + $0x70] ss:$8 sps:$4 sm:$0xff]  }
  0x1a   :  { %347 = vmatpush1.bf16.msra.mxu1 %v690_v13  ;;  %v709_v26 = vld [vmem:[#allocation2 + $0x84] ss:$8 sps:$4 sm:$0xff]   ;;  %v711_v27 = vld [vmem:[#allocation2 + $0x80] ss:$8 sps:$4 sm:$0xff]   ;;  %v712_v28 = vld [vmem:[#allocation2 + $0x94] ss:$8 sps:$4 sm:$0xff]  }
  0x1b   :  { %602 = vmatmul.mubr.msk.bf16.vlgmr.msra.gmra.mrb[0].mxu0 %vm80_vm1, %v49_v12  ;;  %348 = vmatprep.subr.bf16.mxu1 %v691_v14  ;;  %v714_v29 = vld [vmem:[#allocation2 + $0x90] ss:$8 sps:$4 sm:$0xff]   ;;  %v715_v30 = vld [vmem:[#allocation2 + $0xa4] ss:$8 sps:$4 sm:$0xff]   ;;  %v717_v31 = vld [vmem:[#allocation2 + $0xa0] ss:$8 sps:$4 sm:$0xff]  }
  0x1c   :  { %v718_v32 = vld [vmem:[#allocation2 + $0xb4] ss:$8 sps:$4 sm:$0xff]   ;;  %v720_v33 = vld [vmem:[#allocation2 + $0xb0] ss:$8 sps:$4 sm:$0xff]   ;;  %v721_v34 = vld [vmem:[#allocation2 + $0xc4] ss:$8 sps:$4 sm:$0xff]  }
  0x1d   :  { %v723_v35 = vld [vmem:[#allocation2 + $0xc0] ss:$8 sps:$4 sm:$0xff]   ;;  %v724_v36 = vld [vmem:[#allocation2 + $0xd4] ss:$8 sps:$4 sm:$0xff]   ;;  %v726_v37 = vld [vmem:[#allocation2 + $0xd0] ss:$8 sps:$4 sm:$0xff]  }
  0x1e   :  { %349 = vmatpush1.bf16.msra.mxu1 %v693_v15  ;;  %v727_v38 = vld [vmem:[#allocation2 + $0xe4] ss:$8 sps:$4 sm:$0xff]   ;;  %v729_v39 = vld [vmem:[#allocation2 + $0xe0] ss:$8 sps:$4 sm:$0xff]   ;;  %v730_v40 = vld [vmem:[#allocation2 + $0xf4] ss:$8 sps:$4 sm:$0xff]  }
  0x1f   :  { %350 = vmatprep.subr.bf16.mxu1 %v694_v16  ;;  %v732_v41 = vld [vmem:[#allocation2 + $0xf0] ss:$8 sps:$4 sm:$0xff]   ;;  %v733_v42 = vld [vmem:[%s932_s5 + $0x40] sm:$0xff]   ;;  %v735_v44 = vld [vmem:[%s932_s5 + $0x48] sm:$0xff]   ;;  %v57_v55 = vsub.s32 0, %v56_v54  ;;  %v61_v57 = vsub.s32 1, %v56_v54 }
  0x20   :  { %v734_v43 = vld [vmem:[%s932_s5] sm:$0xff]   ;;  %654 = vmatprep.subr.bf16.mxu0 %v733_v42  ;;  %v736_v45 = vld [vmem:[%s932_s5 + $0x8] sm:$0xff]   ;;  %v737_v46 = vld [vmem:[%s932_s5 + $0x50] sm:$0xff]  }
  0x21   :  { %655 = vmatpush3.bf16.msra.mxu0 %v734_v43  ;;  %v738_v47 = vld [vmem:[%s932_s5 + $0x10] sm:$0xff]   ;;  %v739_v48 = vld [vmem:[%s932_s5 + $0x58] sm:$0xff]   ;;  %v741_v50 = vld [vmem:[%s932_s5 + $0x60] sm:$0xff]  }
  0x22   :  { %351 = vmatpush1.bf16.msra.mxu1 %v696_v17  ;;  %656 = vmatprep.subr.bf16.mxu0 %v735_v44  ;;  %v740_v49 = vld [vmem:[%s932_s5 + $0x18] sm:$0xff]   ;;  %v742_v51 = vld [vmem:[%s932_s5 + $0x20] sm:$0xff]   ;;  %v743_v52 = vld [vmem:[%s932_s5 + $0x68] sm:$0xff]  }
  0x23   :  { %352 = vmatprep.subr.bf16.mxu1 %v697_v18  ;;  %v53_v56 = vld [vmem:[%s929_s2] sm:$0x3]  ;;  %v744_v10 = vld [vmem:[%s932_s5 + $0x28] sm:$0xff]   ;;  %v745_v11 = vld [vmem:[%s932_s5 + $0x70] sm:$0xff]  }
  0x24   :  { %v58_v58 = vrot.slane %v53_v56, %v57_v55  ;;  %v62_v59 = vrot.slane %v53_v56, %v61_v57  ;;  %v746_v12 = vld [vmem:[%s932_s5 + $0x30] sm:$0xff]   ;;  %v747_v13 = vld [vmem:[%s932_s5 + $0x78] sm:$0xff]   ;;  %v172_v15 = vld [vmem:[%s931_s4] sm:$0x3] }
  0x25   :  { %657 = vmatpush3.bf16.msra.mxu0 %v736_v45  ;;  %v748_v14 = vld [vmem:[%s932_s5 + $0x38] sm:$0xff]   ;;  %v177_v16 = vrot.slane %v172_v15, %v57_v55  ;;  %v181_v17 = vrot.slane %v172_v15, %v61_v57  ;;  %v653_v43 = vld [vmem:[%s935_s8] ss:$0 sm:$0xff] }
  0x26   :  { %353 = vmatpush1.bf16.msra.mxu1 %v699_v19  ;;  %658 = vmatprep.subr.bf16.mxu0 %v737_v46 }
  0x27   :  { %354 = vmatprep.subr.bf16.mxu1 %v700_v20 }
  0x29   :  { %659 = vmatpush3.bf16.msra.mxu0 %v738_v47 }
  0x2a   :  { %355 = vmatpush1.bf16.msra.mxu1 %v702_v21  ;;  %660 = vmatprep.subr.bf16.mxu0 %v739_v48 }
  0x2b   :  { %356 = vmatprep.subr.bf16.mxu1 %v703_v22 }
  0x2d   :  { %661 = vmatpush3.bf16.msra.mxu0 %v740_v49 }
  0x2e   :  { %357 = vmatpush1.bf16.msra.mxu1 %v705_v23  ;;  %662 = vmatprep.subr.bf16.mxu0 %v741_v50 }
  0x2f   :  { %358 = vmatprep.subr.bf16.mxu1 %v706_v24 }
  0x31   :  { %663 = vmatpush3.bf16.msra.mxu0 %v742_v51 }
  0x32   :  { %359 = vmatpush1.bf16.msra.mxu1 %v708_v25  ;;  %664 = vmatprep.subr.bf16.mxu0 %v743_v52 }
  0x33   :  { %360 = vmatprep.subr.bf16.mxu1 %v709_v26 }
  0x35   :  { %665 = vmatpush3.bf16.msra.mxu0 %v744_v10 }
  0x36   :  { %361 = vmatpush1.bf16.msra.mxu1 %v711_v27  ;;  %666 = vmatprep.subr.bf16.mxu0 %v745_v11 }
  0x37   :  { %362 = vmatprep.subr.bf16.mxu1 %v712_v28 }
  0x39   :  { %667 = vmatpush3.bf16.msra.mxu0 %v746_v12 }
  0x3a   :  { %363 = vmatpush1.bf16.msra.mxu1 %v714_v29  ;;  %668 = vmatprep.subr.bf16.mxu0 %v747_v13 }
  0x3b   :  { %364 = vmatprep.subr.bf16.mxu1 %v715_v30 }
  0x3d   :  { %669 = vmatpush3.bf16.msra.mxu0 %v748_v14 }
  0x3e   :  { %365 = vmatpush1.bf16.msra.mxu1 %v717_v31 }
  0x3f   :  { %366 = vmatprep.subr.bf16.mxu1 %v718_v32 }
  0x42   :  { %367 = vmatpush1.bf16.msra.mxu1 %v720_v33  ;;  %v635_v33 = vld [vmem:[%s933_s6] ss:$0 sm:$0xff] }
  0x43   :  { %368 = vmatprep.subr.bf16.mxu1 %v721_v34 }
  0x46   :  { %369 = vmatpush1.bf16.msra.mxu1 %v723_v35 }
  0x47   :  { %370 = vmatprep.subr.bf16.mxu1 %v724_v36 }
  0x4a   :  { %371 = vmatpush1.bf16.msra.mxu1 %v726_v37 }
  0x4b   :  { %372 = vmatprep.subr.bf16.mxu1 %v727_v38 }
  0x4e   :  { %373 = vmatpush1.bf16.msra.mxu1 %v729_v39 }
  0x4f   :  { %374 = vmatprep.subr.bf16.mxu1 %v730_v40 }
  0x52   :  { %375 = vmatpush1.bf16.msra.mxu1 %v732_v41  ;;  %v652_v41 = vld [vmem:[%s934_s7] ss:$0 sm:$0xff] }
  0xee   :  { %v125_v60 = vpop.f32.mrb[0].mxu0 }
  0xef   :  { %v126_v61 = vadd.f32 %v125_v60, %v58_v58  ;;  %v127_v62 = vpop.f32.mrb[1].mxu0 }
  0xf0   :  { %v128_v63 = vadd.f32 %v127_v62, %v62_v59  ;;  %v129_v0 = vpop.f32.mrb[2].mxu0 }
  0xf1   :  { %v130_v1 = vadd.f32 %v129_v0, %v58_v58  ;;  %v131_v2 = vpop.f32.mrb[3].mxu0  ;;  %v134_v4 = vmax.f32 %v126_v61, 0.0 }
  0xf2   :  { %v132_v3 = vadd.f32 %v131_v2, %v62_v59  ;;  %v135_v6 = vmax.f32 %v128_v63, 0.0 }
  0xf3   :  { %v136_v5 = vmax.f32 %v130_v1, 0.0 }
  0xf4   :  { %v137_v7 = vmax.f32 %v132_v3, 0.0 }
  0xf5   :  { %v138_v8 = vpack.c.bf16 %v136_v5, %v134_v4 }
  0xf6   :  { %v139_v9 = vpack.c.bf16 %v137_v7, %v135_v6 }
  0xf8   :  { %376 = vmatprep.mubr.bf16.mxu1 %v139_v9 }
  0xf9   :  { %377 = vmatmul.mubr.bf16.vlgmr.msra.gmra.mrb[0].mxu1 %v138_v8 }
 0x1cc   :  { %v378_v18 = vpop.f32.mrb[0].mxu1 }
 0x1cd   :  { %v379_v19 = vadd.f32 %v378_v18, %v177_v16  ;;  %v380_v20 = vpop.f32.mrb[1].mxu1 }
 0x1ce   :  { %v381_v21 = vadd.f32 %v380_v20, %v181_v17  ;;  %v382_v22 = vpop.f32.mrb[2].mxu1 }
 0x1cf   :  { %v383_v23 = vadd.f32 %v382_v22, %v177_v16  ;;  %v384_v24 = vpop.f32.mrb[3].mxu1  ;;  %v387_v26 = vmax.f32 %v379_v19, 0.0 }
 0x1d0   :  { %v385_v25 = vadd.f32 %v384_v24, %v181_v17  ;;  %v388_v28 = vmax.f32 %v381_v21, 0.0 }
 0x1d1   :  { %v389_v27 = vmax.f32 %v383_v23, 0.0 }
 0x1d2   :  { %v390_v29 = vmax.f32 %v385_v25, 0.0 }
 0x1d3   :  { %v391_v30 = vpack.c.bf16 %v389_v27, %v387_v26 }
 0x1d4   :  { %v392_v31 = vpack.c.bf16 %v390_v29, %v388_v28 }
 0x1d6   :  { %560 = vmatprep.mubr.bf16.mxu0 %v392_v31 }
 0x1d7   :  { %561 = vmatmul.mubr.bf16.vlgmr.msra.gmra.mrb[4].mxu0 %v391_v30 }
 0x2aa   :  { %v670_v32 = vpop.f32.mrb[4].mxu0 }
 0x2ab   :  { %v671_v34 = vpop.f32.mrb[5].mxu0 }
 0x2ac   :  { %v672_v35 = vadd.f32 %v671_v34, %v670_v32  ;;  %v673_v36 = vpop.f32.mrb[6].mxu0 }
 0x2ad   :  { %v674_v37 = vpop.f32.mrb[7].mxu0 }
 0x2ae   :  { %v563_v38 = vadd.f32 %v672_v35, %v635_v33  ;;  %v675_v39 = vadd.f32 %v674_v37, %v673_v36 }
 0x2b0   :  { %749 = vtanh.f32 %v563_v38  ;;  %v566_v40 = vadd.f32 %v675_v39, %v635_v33 }
 0x2b2   :  { %751 = vtanh.f32 %v566_v40 }
 0x2ba   :  { %v750_v42 = vpop.eup %749 }
 0x2bb   :  { %v578_v44 = vmul.f32 %v750_v42, %v652_v41 }
 0x2bc   :  { %v752_v45 = vpop.eup %751 }
 0x2bd   :  { %v587_v46 = vadd.f32 %v653_v43, %v578_v44  ;;  %v579_v47 = vmul.f32 %v752_v45, %v652_v41 }
 0x2bf   :  { %590 = vst.msk [vmem:[%s936_s9] sm:$0xff] %vm589_vm2, %v587_v46  ;;  %v588_v48 = vadd.f32 %v653_v43, %v579_v47 }
 0x2c1   :  { %591 = vst.msk [vmem:[%s936_s9 + $0x8] sm:$0xff] %vm589_vm2, %v588_v48 }
 0x2c2   :  { %596 = vsyncpa [#allocation3], 1 }

</bundles_post_ra>
